<compile_context>
chip_gen: v6e
topology: v6e:2x2x1
jax: 0.10.0
libtpu: 0.0.40
codegen_flags: <defaults>
</compile_context>

<pallas_src>
import functools

import jax
import jax.numpy as jnp
from jax.experimental import pallas as pl
from jax.experimental.pallas import tpu as pltpu


def _round_up(n, m):
    return ((n + m - 1) // m) * m


def _sine_layer_kernel(x_ref, wt_ref, b_ref, o_ref, *, residual):
    # x_ref : (tm, in_p)       VMEM
    # wt_ref: (in_p, out_p)    VMEM (resident across the row grid)
    # b_ref : (1, out_p)       VMEM
    # o_ref : (tm, out_p)      VMEM
    x = x_ref[...]
    z = jnp.dot(x, wt_ref[...], preferred_element_type=jnp.float32)
    z = z + b_ref[...]                     # broadcast bias over rows
    s = jnp.sin(z)                         # omega_0 already folded into W, b
    if residual:
        s = s + x.astype(jnp.float32)
    o_ref[...] = s.astype(o_ref.dtype)


def prepare_sine_layer_params(weight, bias, *, omega_0=30.0):
    """One-time parameter prep: fold omega_0 and pre-transpose the weight.

    weight: (out_features, in_features) PyTorch layout
    bias  : (out_features,)
    Returns (wt, b2) with wt: (in_features, out_features), b2: (1, out_features).
    """
    omega_0 = jnp.asarray(omega_0, dtype=weight.dtype)
    wt = (omega_0 * weight).T
    b2 = (omega_0 * bias).reshape(1, -1)
    return wt, b2


def _choose_tm(M, in_p, out_p, itemsize, vmem_limit_bytes):
    """Largest row tile that keeps double-buffered x/out tiles + the resident
    weight comfortably inside the scoped VMEM limit (works for v7x's 64 MiB)."""
    weight_bytes = in_p * out_p * itemsize + out_p * itemsize   # Wt + bias
    # double-buffered input tile + double-buffered output tile, per row
    row_bytes = 2 * (in_p + out_p) * itemsize
    budget = int(0.75 * vmem_limit_bytes) - 2 * weight_bytes
    tm = budget // max(row_bytes, 1)
    tm = max(8, min(1024, tm))             # 512-1024 rows is the ~85% roofline regime
    tm = min(tm, _round_up(M, 8))          # no point tiling past the batch
    return _round_up(tm, 8)                # (8,128) sublane rule


def sine_layer(x, wt, b, *, residual=False, tm=None,
               vmem_limit_bytes=64 * 1024 * 1024):
    """x: (M, in_features); wt: (in_features, out_features) pre-scaled by omega_0;
    b: (1, out_features) pre-scaled by omega_0."""
    M, in_f = x.shape
    in_f_w, out_f = wt.shape
    if in_f != in_f_w:
        raise ValueError("x / weight feature mismatch")
    if b.shape != (1, out_f):
        raise ValueError("bias must be (1, out_features)")
    if residual and in_f != out_f:
        raise ValueError("residual requires in_features == out_features")

    # Pad feature dims to multiples of 128: lane-dense output stores and full
    # MXU columns.  Zero-padding is exact (padded x cols x padded W rows = 0).
    in_p = _round_up(in_f, 128)
    out_p = _round_up(out_f, 128)
    if in_p != in_f:
        x = jnp.pad(x, ((0, 0), (0, in_p - in_f)))
    if in_p != in_f or out_p != out_f:
        wt = jnp.pad(wt, ((0, in_p - in_f), (0, out_p - out_f)))
        b = jnp.pad(b, ((0, 0), (0, out_p - out_f)))

    itemsize = jnp.dtype(x.dtype).itemsize
    if tm is None:
        tm = _choose_tm(M, in_p, out_p, itemsize, vmem_limit_bytes)
    else:
        tm = _round_up(min(tm, _round_up(M, 8)), 8)

    kernel = functools.partial(_sine_layer_kernel, residual=bool(residual))

    out = pl.pallas_call(
        kernel,
        out_shape=jax.ShapeDtypeStruct((M, out_p), x.dtype),
        grid_spec=pltpu.PrefetchScalarGridSpec(
            num_scalar_prefetch=0,
            grid=(pl.cdiv(M, tm),),
            in_specs=[
                pl.BlockSpec((tm, in_p), lambda i: (i, 0)),
                pl.BlockSpec((in_p, out_p), lambda i: (0, 0)),
                pl.BlockSpec((1, out_p), lambda i: (0, 0)),
            ],
            out_specs=pl.BlockSpec((tm, out_p), lambda i: (i, 0)),
        ),
        compiler_params=pltpu.CompilerParams(
            dimension_semantics=("parallel",),
            vmem_limit_bytes=vmem_limit_bytes,
        ),
    )(x, wt, b)

    if out_p != out_f:
        out = out[:, :out_f]
    return out


def init_sine_layer_params(key, in_features, out_features, *, is_first=False,
                           omega_0=30.0):
    """Deterministic SIREN init matching the PyTorch module's init_weights."""
    kw, kb = jax.random.split(key)
    if is_first:
        bound_w = 1.0 / in_features
    else:
        bound_w = float(jnp.sqrt(6.0 / in_features) / omega_0)
    weight = jax.random.uniform(
        kw, (out_features, in_features), minval=-bound_w, maxval=bound_w,
        dtype=jnp.float32)
    # nn.Linear default bias init: U(-1/sqrt(in_features), 1/sqrt(in_features))
    bound_b = 1.0 / float(jnp.sqrt(in_features))
    bias = jax.random.uniform(
        kb, (out_features,), minval=-bound_b, maxval=bound_b, dtype=jnp.float32)
    return weight, bias


if __name__ == "__main__":
    key = jax.random.PRNGKey(0)
    k_x, k_p = jax.random.split(key)

    # Small shapes consistent with the module: batch of 8 points, hidden=32.
    M, in_features, out_features = 8, 32, 32
    omega_0 = 30.0
    residual = True  # in_features == out_features so the residual add is valid

    x = jax.random.normal(k_x, (M, in_features), dtype=jnp.float32)
    weight, bias = init_sine_layer_params(
        k_p, in_features, out_features, is_first=True, omega_0=omega_0)

    # One-time parameter prep (fold omega_0, pre-transpose).
    wt, b2 = prepare_sine_layer_params(weight, bias, omega_0=omega_0)

    out = sine_layer(x, wt, b2, residual=residual)
    out = jax.block_until_ready(out)

    # Pure-JAX reference (matches the PyTorch module exactly).
    ref = jnp.sin(omega_0 * (x @ weight.T + bias))
    if residual:
        ref = ref + x

    assert out.shape == (M, out_features)
    assert jnp.allclose(out, ref, atol=1e-4, rtol=1e-4), "mismatch vs reference"

    print("KERNEL_OK")
</pallas_src>

<mosaic_0001>
module attributes {stable_mosaic.version = 11 : i64} {
  func.func @_sine_layer_kernel(%arg0: i32, %arg1: memref<8x128xf32, #tpu.memory_space<vmem>>, %arg2: memref<128x128xf32, #tpu.memory_space<vmem>>, %arg3: memref<1x128xf32, #tpu.memory_space<vmem>>, %arg4: memref<8x128xf32, #tpu.memory_space<vmem>>) attributes {dimension_semantics = [#tpu.dimension_semantics<parallel>], iteration_bounds = array<i64: 1>, scalar_prefetch = 0 : i64, scratch_operands = 0 : i64, tpu.core_type = #tpu.core_type<tc>, window_params = [{transform_indices = @transform_0, window_bounds = array<i64: 8, 128>}, {pipeline_mode = #tpu.pipeline_mode<synchronous>, transform_indices = @transform_1, window_bounds = array<i64: 128, 128>}, {pipeline_mode = #tpu.pipeline_mode<synchronous>, transform_indices = @transform_2, window_bounds = array<i64: 1, 128>}, {transform_indices = @transform_3, window_bounds = array<i64: 8, 128>}]} {
    %c0 = arith.constant 0 : index
    %c0_0 = arith.constant 0 : index
    %0 = vector.load %arg1[%c0, %c0_0] : memref<8x128xf32, #tpu.memory_space<vmem>>, vector<8x128xf32>
    %c0_1 = arith.constant 0 : index
    %c0_2 = arith.constant 0 : index
    %1 = vector.load %arg2[%c0_1, %c0_2] : memref<128x128xf32, #tpu.memory_space<vmem>>, vector<128x128xf32>
    %cst = arith.constant dense<0.000000e+00> : vector<8x128xf32>
    %2 = tpu.matmul %0, %1, %cst {dimension_numbers = #tpu.dot_dimension_numbers<[1], [0], [0], [1], [0, 0, 1, 1], [], []>} : vector<8x128xf32>, vector<128x128xf32>, vector<8x128xf32> -> vector<8x128xf32>
    %c0_3 = arith.constant 0 : index
    %c0_4 = arith.constant 0 : index
    %3 = vector.load %arg3[%c0_3, %c0_4] : memref<1x128xf32, #tpu.memory_space<vmem>>, vector<1x128xf32>
    %4 = vector.broadcast %3 : vector<1x128xf32> to vector<8x128xf32>
    %5 = arith.addf %2, %4 : vector<8x128xf32>
    %6 = math.sin %5 : vector<8x128xf32>
    %7 = arith.addf %6, %0 : vector<8x128xf32>
    %c0_5 = arith.constant 0 : index
    %c0_6 = arith.constant 0 : index
    %8 = vector.load %arg4[%c0_5, %c0_6] : memref<8x128xf32, #tpu.memory_space<vmem>>, vector<8x128xf32>
    tpu.vector_store %arg4[%c0_5, %c0_6], %7 {strides = array<i32>} : memref<8x128xf32, #tpu.memory_space<vmem>>, vector<8x128xf32>,
    return
  }
  func.func @transform_0(%arg0: i32) -> (i32, i32) {
    %c0_i32 = arith.constant 0 : i32
    %c0_i32_0 = arith.constant 0 : i32
    return %arg0, %c0_i32 : i32, i32
  }
  func.func @transform_1(%arg0: i32) -> (i32, i32) {
    %c0_i32 = arith.constant 0 : i32
    %c0_i32_0 = arith.constant 0 : i32
    %c0_i32_1 = arith.constant 0 : i32
    return %c0_i32, %c0_i32_0 : i32, i32
  }
  func.func @transform_2(%arg0: i32) -> (i32, i32) {
    %c0_i32 = arith.constant 0 : i32
    %c0_i32_0 = arith.constant 0 : i32
    %c0_i32_1 = arith.constant 0 : i32
    return %c0_i32, %c0_i32_0 : i32, i32
  }
  func.func @transform_3(%arg0: i32) -> (i32, i32) {
    %c0_i32 = arith.constant 0 : i32
    %c0_i32_0 = arith.constant 0 : i32
    return %arg0, %c0_i32 : i32, i32
  }
}

</mosaic_0001>

<bundles_post_ra>
// kernel: tpu_custom_call.1
= control target key start
LH: loop header
LB: loop body
LE: loop exit
PB: predicated region body
PF: predicated region fallthrough
CT: control target
= control target key end

     0   :  { %8 = vsyncpa [#allocation3], 0  ;;  %s471_s0 = inlined_call_operand.hbm [shape: f32[8,128], index: 0, kind: input, shape index: {}]   ;;  %s472_s1 = inlined_call_operand.hbm [shape: f32[128,128], index: 1, kind: input, shape index: {}]   ;;  %s473_s2 = inlined_call_operand.vmem [shape: f32[1,128], index: 2, kind: input, shape index: {}]   ;;  %s474_s3 = inlined_call_operand.hbm [shape: f32[8,128], index: 3, kind: output, shape index: {}]  }
   0x1   :  { %9 = vsyncpa [#allocation6], 0 }
   0x2   :  { %10 = vsyncpa [#allocation4], 0  ;;  %s401_s12 = smov [#allocation2]   ;;  %s402_s14 = smov [#allocation5]  }
   0x3   :  { %s17_s13 = sshll.u32 %s401_s12, 4  ;;  %s26_s15 = sshll.u32 %s402_s14, 4  ;;  %s18_s13 = int_to_ptr.vmem [resolvable:$true] %s17_s13  ;;  %s27_s15 = int_to_ptr.vmem [resolvable:$true] %s26_s15 }
   0x4   :  { %s343_s16 = scalar_lea.vmem %s18_s13, 128  ;;  %p348_p1 = scmp.lt.s32.totalorder %s18_s13, %s18_s13 }
   0x5   :  { %p344_p0 = scmp.ne.s32.totalorder %s18_s13, %s343_s16  ;;  %p349_p2 = scmp.lt.s32.totalorder %s343_s16, %s343_s16 }
   0x7   :  { %p350_p3 = por %p349_p2, %p348_p1 }
   0x9   :  { %p351_p4 = pnand %p350_p3, %p344_p0 }
   0xb   :  { %354 = shalt.err (!%p351_p4)
}
   0xc   :  { %20 = dma.hbm_to_vmem [thread:$0]  %s471_s0, 128, %s18_s13, [#allocation3]  }
   0xd   :  { %s363_s19 = scalar_lea.vmem %s27_s15, 2048  ;;  %p368_p6 = scmp.lt.s32.totalorder %s27_s15, %s27_s15 }
   0xe   :  { %p364_p5 = scmp.ne.s32.totalorder %s27_s15, %s363_s19  ;;  %p369_p7 = scmp.lt.s32.totalorder %s363_s19, %s363_s19 }
  0x10   :  { %p370_p8 = por %p369_p7, %p368_p6 }
  0x12   :  { %p371_p9 = pnand %p370_p8, %p364_p5 }
  0x14   :  { %374 = shalt.err (!%p371_p9)
}
  0x15   :  { %s403_s20 = smov 128   ;;  %s404_s21 = smov 8  }
  0x16   :  { %32 = dma.hbm_to_vmem [thread:$0]  %s472_s1, 2048, %s27_s15, [#allocation6], %s403_s20, %s403_s20, %s404_s21  }
  0x17   :  { %395 = dma.done.wait [#allocation3], 128  }
  0x18   :  { %396 = vsyncadd [#allocation3], 4294967168 }
  0x19   :  { %397 = dma.done.wait [#allocation6], 2048  }
  0x1a   :  { %398 = vsyncadd [#allocation6], 4294965248  ;;  %v405_v0 = vmov 0.0   ;;  %vm406_vm0 = vmmov 0   ;;  %v57_v1 = vld [vmem:[#allocation5 + $0x78] sm:$0xff]  ;;  %v56_v2 = vld [vmem:[#allocation5 + $0x70] sm:$0xff] }
  0x1b   :  { %279 = vmatprep.subr.mxu0 %v405_v0  ;;  %311 = vmatprep.mubr.msk.f32.mxu0 %vm406_vm0, %v405_v0  ;;  %v55_v3 = vld [vmem:[#allocation5 + $0x68] sm:$0xff]  ;;  %v54_v4 = vld [vmem:[#allocation5 + $0x60] sm:$0xff]  ;;  %v53_v5 = vld [vmem:[#allocation5 + $0x58] sm:$0xff]  ;;  %v407_v32 = vmov 683565275  }
  0x1c   :  { %280 = vmatpush3.msra.mxu0 %v57_v1  ;;  %v52_v6 = vld [vmem:[#allocation5 + $0x50] sm:$0xff]  ;;  %v51_v7 = vld [vmem:[#allocation5 + $0x48] sm:$0xff]  ;;  %v50_v8 = vld [vmem:[#allocation5 + $0x40] sm:$0xff]  ;;  %v408_v34 = vmov 2475754826  }
  0x1d   :  { %281 = vmatprep.subr.mxu0 %v405_v0  ;;  %v49_v9 = vld [vmem:[#allocation5 + $0x38] sm:$0xff]  ;;  %v48_v10 = vld [vmem:[#allocation5 + $0x30] sm:$0xff]  ;;  %v47_v11 = vld [vmem:[#allocation5 + $0x28] sm:$0xff]  ;;  %v409_v37 = vmov 2131351028  }
  0x1e   :  { %282 = vmatpush3.msra.mxu0 %v56_v2  ;;  %v46_v12 = vld [vmem:[#allocation5 + $0x20] sm:$0xff]  ;;  %v45_v13 = vld [vmem:[#allocation5 + $0x18] sm:$0xff]  ;;  %v44_v14 = vld [vmem:[#allocation5 + $0x10] sm:$0xff]  ;;  %v410_v40 = vmov 2102212464  }
  0x1f   :  { %283 = vmatprep.subr.mxu0 %v405_v0  ;;  %v43_v15 = vld [vmem:[#allocation5 + $0x8] sm:$0xff]  ;;  %v42_v16 = vld [vmem:[#allocation5] sm:$0xff]  ;;  %v440_v17 = vld [vmem:[#allocation2] sm:$0xff]  ;;  %v411_v43 = vmov 920167782  }
  0x20   :  { %284 = vmatpush3.msra.mxu0 %v55_v3  ;;  %v257_v18 = vld [vmem:[%s473_s2] ss:$0 sm:$0xff]  ;;  %v412_v46 = vmov 1326507024   ;;  %s413_s2 = smov [#allocation7]  }
  0x21   :  { %285 = vmatprep.subr.mxu0 %v405_v0  ;;  %s247_s24 = sshll.u32 %s413_s2, 4  ;;  %s248_s24 = int_to_ptr.vmem [resolvable:$true] %s247_s24 }
  0x22   :  { %286 = vmatpush3.msra.mxu0 %v54_v4  ;;  %s375_s25 = scalar_lea.vmem %s248_s24, 128  ;;  %p380_p11 = scmp.lt.s32.totalorder %s248_s24, %s248_s24 }
  0x23   :  { %287 = vmatprep.subr.mxu0 %v405_v0  ;;  %p376_p10 = scmp.ne.s32.totalorder %s248_s24, %s375_s25  ;;  %p381_p12 = scmp.lt.s32.totalorder %s375_s25, %s375_s25 }
  0x24   :  { %288 = vmatpush3.msra.mxu0 %v53_v5 }
  0x25   :  { %289 = vmatprep.subr.mxu0 %v405_v0  ;;  %p382_p13 = por %p381_p12, %p380_p11 }
  0x26   :  { %290 = vmatpush3.msra.mxu0 %v52_v6 }
  0x27   :  { %291 = vmatprep.subr.mxu0 %v405_v0  ;;  %p383_p0 = pnand %p382_p13, %p376_p10 }
  0x28   :  { %292 = vmatpush3.msra.mxu0 %v51_v7 }
  0x29   :  { %293 = vmatprep.subr.mxu0 %v405_v0 }
  0x2a   :  { %294 = vmatpush3.msra.mxu0 %v50_v8 }
  0x2b   :  { %295 = vmatprep.subr.mxu0 %v405_v0 }
  0x2c   :  { %296 = vmatpush3.msra.mxu0 %v49_v9 }
  0x2d   :  { %297 = vmatprep.subr.mxu0 %v405_v0 }
  0x2e   :  { %298 = vmatpush3.msra.mxu0 %v48_v10 }
  0x2f   :  { %299 = vmatprep.subr.mxu0 %v405_v0 }
  0x30   :  { %300 = vmatpush3.msra.mxu0 %v47_v11 }
  0x31   :  { %301 = vmatprep.subr.mxu0 %v405_v0 }
  0x32   :  { %302 = vmatpush3.msra.mxu0 %v46_v12 }
  0x33   :  { %303 = vmatprep.subr.mxu0 %v405_v0 }
  0x34   :  { %304 = vmatpush3.msra.mxu0 %v45_v13 }
  0x35   :  { %305 = vmatprep.subr.mxu0 %v405_v0 }
  0x36   :  { %306 = vmatpush3.msra.mxu0 %v44_v14 }
  0x37   :  { %307 = vmatprep.subr.mxu0 %v405_v0 }
  0x38   :  { %308 = vmatpush3.msra.mxu0 %v43_v15 }
  0x39   :  { %309 = vmatprep.subr.mxu0 %v405_v0 }
  0x3a   :  { %310 = vmatpush3.msra.mxu0 %v42_v16 }
  0x3b   :  { %312 = vmatmul.mubr.f32.vlgmr.msra.gmra.mxu0 %v440_v17 }
  0xfb   :  { %v131_v19 = vpop.f32.mrf.mxu0 }
  0xfc   :  { %v446_v20 = vadd.f32 %v257_v18, %v131_v19 }
  0xfd   :  { %v313_v21 = vpop.f32.mrf.mxu0 }
  0xfe   :  { %v138_v22 = vand.u32 2139095040, %v446_v20  ;;  %v135_v26 = vand.u32 2147483647, %v446_v20  ;;  %vm137_vm8 = vcmp.lt.s32.totalorder %v446_v20, 0  ;;  %vm227_vm13 = vweird.f32 %v446_v20 }
 0x100   :  { %v139_v23 = vshrl.u32 %v138_v22, 23  ;;  %v142_v29 = vand.u32 8388607, %v135_v26  ;;  %vm136_vm9 = vcmp.le.f32.partialorder %v135_v26, 0.7853982 }
 0x102   :  { %v258_v24 = vadd.s32 4294967169, %v139_v23  ;;  %v143_v48 = vor.u32 8388608, %v142_v29 }
 0x104   :  { %v145_v25 = vadd.s32 1, %v258_v24  ;;  %v183_v62 = vshll.u32 %v143_v48, 8 }
 0x106   :  { %vm146_vm1 = vcmp.gt.s32.totalorder %v145_v25, 0 }
 0x107   :  { %v147_v27 = vsel %vm146_vm1, %v145_v25, 0 }
 0x108   :  { %v149_v28 = vand.u32 31, %v147_v27  ;;  %v148_v31 = vshrl.u32 %v147_v27, 5 }
 0x10a   :  { %v150_v30 = vsub.s32 32, %v149_v28  ;;  %v152_v33 = vshll.u32 %v407_v32, %v149_v28  ;;  %v155_v35 = vshll.u32 %v408_v34, %v149_v28  ;;  %v158_v39 = vshll.u32 %v409_v37, %v149_v28 }
 0x10b   :  { %v161_v42 = vshll.u32 %v410_v40, %v149_v28  ;;  %v164_v45 = vshll.u32 %v411_v43, %v149_v28  ;;  %vm167_vm2 = vcmp.lt.s32.totalorder %v148_v31, 1  ;;  %vm170_vm3 = vcmp.lt.s32.totalorder %v148_v31, 4 }
 0x10c   :  { %v153_v36 = vshrl.u32 %v408_v34, %v150_v30  ;;  %v156_v38 = vshrl.u32 %v409_v37, %v150_v30  ;;  %v159_v41 = vshrl.u32 %v410_v40, %v150_v30  ;;  %v162_v44 = vshrl.u32 %v411_v43, %v150_v30 }
 0x10d   :  { %v165_v47 = vshrl.u32 %v412_v46, %v150_v30  ;;  %v151_v57 = vshrl.u32 %v407_v32, %v150_v30  ;;  %vm169_vm4 = vcmp.lt.s32.totalorder %v148_v31, 3  ;;  %vm168_vm5 = vcmp.lt.s32.totalorder %v148_v31, 2 }
 0x10e   :  { %v154_v49 = vor.u32 %v153_v36, %v152_v33  ;;  %v157_v50 = vor.u32 %v156_v38, %v155_v35  ;;  %v160_v51 = vor.u32 %v159_v41, %v158_v39  ;;  %v163_v52 = vor.u32 %v162_v44, %v161_v42 }
 0x10f   :  { %v166_v53 = vor.u32 %v165_v47, %v164_v45 }
 0x110   :  { %v172_v54 = vsel %vm170_vm3, %v160_v51, 2102212464  ;;  %v175_v55 = vsel %vm167_vm2, %v154_v49, %v157_v50  ;;  %v179_v56 = vsel %vm167_vm2, %v157_v50, %v160_v51  ;;  %v176_v58 = vsel %vm170_vm3, %v163_v52, 920167782 }
 0x111   :  { %v180_v59 = vsel %vm170_vm3, %v166_v53, 1326507024  ;;  %v177_v60 = vsel %vm169_vm4, %v160_v51, %v176_v58  ;;  %v171_v63 = vsel %vm167_vm2, %v151_v57, %v154_v49  ;;  %v173_v0 = vsel %vm169_vm4, %v157_v50, %v172_v54 }
 0x112   :  { %v181_v61 = vsel %vm169_vm4, %v163_v52, %v180_v59  ;;  %v178_v1 = vsel %vm168_vm5, %v175_v55, %v177_v60  ;;  %v174_v7 = vsel %vm168_vm5, %v171_v63, %v173_v0 }
 0x113   :  { %v182_v2 = vsel %vm168_vm5, %v179_v56, %v181_v61  ;;  %v455_v5 = vmul.u32.u64.low %v183_v62, %v178_v1  ;;  %v456_v6 = vmul.u32.u64.high %v183_v62, %v178_v1, %v455_v5  ;;  %v190_v9 = vmul.u32 %v183_v62, %v174_v7 }
 0x114   :  { %v452_v3 = vmul.u32.u64.low %v183_v62, %v182_v2  ;;  %v453_v4 = vmul.u32.u64.high %v183_v62, %v182_v2, %v452_v3 }
 0x115   :  { %v193_v8 = vadd.s32 1, %v456_v6 }
 0x116   :  { %vm192_vm6 = vc.u32 %v453_v4, %v455_v5  ;;  %v191_v23 = vadd.s32 %v455_v5, %v453_v4 }
 0x117   :  { %v194_v10 = vsel %vm192_vm6, %v193_v8, %v456_v6 }
 0x118   :  { %v195_v11 = vadd.s32 %v194_v10, %v190_v9 }
 0x11a   :  { %v196_v12 = vadd.s32 536870912, %v195_v11 }
 0x11c   :  { %v197_v13 = vshrl.u32 %v196_v12, 30 }
 0x11e   :  { %v198_v14 = vshll.u32 %v197_v13, 30  ;;  %v221_v37 = vsub.s32 4, %v197_v13 }
 0x120   :  { %v199_v15 = vsub.s32 %v195_v11, %v198_v14  ;;  %v222_v40 = vsel %vm137_vm8, %v221_v37, %v197_v13 }
 0x121   :  { %v224_v41 = vsel %vm136_vm9, 0, %v222_v40 }
 0x122   :  { %v201_v16 = vsub.s32 0, %v199_v15  ;;  %v228_v42 = vadd.s32 3, %v224_v41 }
 0x124   :  { %v259_v18 = vmin.u32 %v201_v16, %v199_v15  ;;  %v229_v43 = vand.u32 3, %v228_v42 }
 0x126   :  { %v203_v19 = vclz %v259_v18  ;;  %vm234_vm10 = vcmp.eq.s32.totalorder %v229_v43, 2  ;;  %vm231_vm11 = vcmp.eq.s32.totalorder %v229_v43, 0  ;;  %vm230_vm12 = vcmp.lt.s32.totalorder %v229_v43, 2 }
 0x128   :  { %v260_v21 = vadd.s32 4294967294, %v203_v19 }
 0x12a   :  { %vm261_vm7 = vcmp.lt.s32.totalorder %v260_v21, 0 }
 0x12b   :  { %v206_v22 = vsel %vm261_vm7, 0, %v260_v21 }
 0x12c   :  { %v207_v24 = vsub.s32 32, %v206_v22  ;;  %v211_v25 = vsub.s32 4294967266, %v206_v22  ;;  %v208_v27 = vshll.u32 %v199_v15, %v206_v22 }
 0x12e   :  { %v209_v28 = vshrl.u32 %v191_v23, %v207_v24  ;;  %v212_v29 = vadd.s32 127, %v211_v25 }
 0x130   :  { %v210_v30 = vor.u32 %v209_v28, %v208_v27  ;;  %v213_v31 = vshll.u32 %v212_v29, 23 }
 0x132   :  { %v214_v32 = vor.u32 4788187, %v213_v31  ;;  %v217_v34 = vcvt.s32.f32 %v210_v30 }
 0x134   :  { %v215_v33 = vand.u32 2147483647, %v214_v32 }
 0x136   :  { %v218_v35 = vmul.f32 %v217_v34, %v215_v33 }
 0x138   :  { %v219_v36 = vxor.u32 2147483648, %v218_v35 }
 0x13a   :  { %v220_v38 = vsel %vm137_vm8, %v219_v36, %v218_v35 }
 0x13b   :  { %v223_v39 = vsel %vm136_vm9, %v446_v20, %v220_v38 }
 0x13c   :  { %331 = vcosq.f32 %v223_v39 }
 0x13d   :  { %333 = vsinq.f32 %v223_v39 }
 0x149   :  { %v332_v44 = vpop.eup %331 }
 0x14a   :  { %v334_v45 = vpop.eup %333  ;;  %v235_v46 = vxor.u32 2147483648, %v332_v44 }
 0x14b   :  { %v232_v47 = vxor.u32 2147483648, %v334_v45 }
 0x14c   :  { %v236_v48 = vsel %vm234_vm10, %v235_v46, %v334_v45 }
 0x14d   :  { %v233_v49 = vsel %vm231_vm11, %v332_v44, %v232_v47 }
 0x14e   :  { %v237_v26 = vsel %vm230_vm12, %v233_v49, %v236_v48 }
 0x14f   :  { %v238_v50 = vsel %vm227_vm13, nan, %v237_v26 }
 0x150   :  { %v239_v51 = vadd.f32 %v238_v50, %v440_v17 }
 0x152   :  { %240 = vst [vmem:[#allocation7] sm:$0xff] %v239_v51 }
 0x153   :  { %386 = shalt.err (!%p383_p0)
}
 0x154   :  { %250 = dma.vmem_to_hbm [thread:$0]  %s248_s24, 128, %s474_s3, [#allocation4]  }
 0x155   :  { %399 = dma.done.wait [#allocation4], 128  }
 0x156   :  { %400 = vsyncadd [#allocation4], 4294967168 }
 0x157   :  { %254 = vsyncpa [#allocation3], 1 }
 0x158   :  { %255 = vsyncpa [#allocation6], 1 }
 0x159   :  { %256 = vsyncpa [#allocation4], 1 }

</bundles_post_ra>
